<compile_context>
chip_gen: v7x
topology: tpu7x:2x2x1
jax: 0.10.0
libtpu: 0.0.40
codegen_flags: <defaults>
</compile_context>

<pallas_src>
import math
from functools import partial

import jax
import jax.numpy as jnp
from jax.experimental import pallas as pl
from jax.experimental.pallas import tpu as pltpu


# ----------------------------------------------------------------------------
# Shared in-kernel math
# ----------------------------------------------------------------------------

def _layernorm_f32(x, g, b, eps):
    # x: (T, D) f32; g, b: (1, D) f32.  Annotated-Transformer LN (unbiased std, eps on std).
    d = x.shape[-1]
    mean = jnp.mean(x, axis=-1, keepdims=True)
    var = jnp.sum((x - mean) ** 2, axis=-1, keepdims=True) / (d - 1)
    std = jnp.sqrt(var)
    return g * (x - mean) / (std + eps) + b


# ----------------------------------------------------------------------------
# Pallas kernels
# ----------------------------------------------------------------------------

def _layernorm_kernel(x_ref, g_ref, b_ref, o_ref, *, eps):
    x = x_ref[...].astype(jnp.float32)
    o_ref[...] = _layernorm_f32(x, g_ref[...], b_ref[...], eps).astype(o_ref.dtype)


def _mha_sublayer_kernel(x_ref, g_ref, b_ref, wqkv_ref, bqkv_ref, wo_ref, bo_ref,
                         bias_ref, o_ref, *, eps, n_heads, scale):
    # Fused sublayer 1, one batch element per grid step.
    #   x_ref:    (1, S, D)
    #   wqkv_ref: (D, 3D) bf16, wo_ref: (D, D) bf16  (VMEM-resident, constant index_map)
    #   bias_ref: (1, 1, S) f32 additive key-padding bias (0 = attend, -1e9 = masked)
    x = x_ref[0].astype(jnp.float32)                       # (S, D) residual, f32
    d = x.shape[1]
    dk = d // n_heads

    xn = _layernorm_f32(x, g_ref[...], b_ref[...], eps)
    qkv = jnp.dot(xn.astype(jnp.bfloat16), wqkv_ref[...],
                  preferred_element_type=jnp.float32) + bqkv_ref[...]      # (S, 3D) f32

    bias = bias_ref[0]                                     # (1, S) f32; broadcasts over query rows

    ctxs = []
    for h in range(n_heads):                               # static unroll; heads = lane slices
        lo = h * dk
        qh = qkv[:, lo:lo + dk].astype(jnp.bfloat16)       # (S, dk)
        kh = qkv[:, d + lo:d + lo + dk].astype(jnp.bfloat16)
        vh = qkv[:, 2 * d + lo:2 * d + lo + dk].astype(jnp.bfloat16)
        # scores = qh @ kh^T * scale + bias   (bf16 MXU, f32 accumulate)
        sc = jax.lax.dot_general(qh, kh, (((1,), (1,)), ((), ())),
                                 preferred_element_type=jnp.float32) * scale + bias
        sc = sc - jnp.max(sc, axis=-1, keepdims=True)      # stable softmax
        p = jnp.exp(sc)
        # divide -> EUP reciprocal + VPU multiply (frees VALU slots)
        p = p * pl.reciprocal(jnp.sum(p, axis=-1, keepdims=True), approx=True)
        ctxs.append(jnp.dot(p.astype(jnp.bfloat16), vh,
                            preferred_element_type=jnp.float32))           # (S, dk) f32

    ctx = jnp.concatenate(ctxs, axis=-1).astype(jnp.bfloat16)              # (S, D)
    y = jnp.dot(ctx, wo_ref[...], preferred_element_type=jnp.float32) + bo_ref[...]
    o_ref[0] = (x + y).astype(o_ref.dtype)                 # single lane-dense (S, D) store


def _ln_ffn_residual_kernel(x_ref, g_ref, b_ref, w1_ref, b1_ref, w2_ref, b2_ref,
                            o_ref, *, eps):
    # Fused LayerNorm -> Linear -> ReLU -> Linear -> residual add.
    x = x_ref[...].astype(jnp.float32)
    xn = _layernorm_f32(x, g_ref[...], b_ref[...], eps)
    h = jnp.dot(xn.astype(jnp.bfloat16), w1_ref[...],
                preferred_element_type=jnp.float32) + b1_ref[...]
    h = jnp.maximum(h, 0.0)
    y = jnp.dot(h.astype(jnp.bfloat16), w2_ref[...],
                preferred_element_type=jnp.float32) + b2_ref[...]
    o_ref[...] = (x + y).astype(o_ref.dtype)


# ----------------------------------------------------------------------------
# Pallas wrappers
# ----------------------------------------------------------------------------

_DEFAULT_SCOPED_VMEM = 16 * 1024 * 1024     # most conservative default (v5e)


def _compiler_params(n_parallel_axes, vmem_hint_bytes):
    sem = ("parallel",) * n_parallel_axes
    if vmem_hint_bytes > _DEFAULT_SCOPED_VMEM:
        # Leave headroom but stay under v7x's 64 MiB physical VMEM per TC.
        limit = int(min(max(2 * vmem_hint_bytes, 32 << 20), 60 << 20))
        return pltpu.CompilerParams(dimension_semantics=sem, vmem_limit_bytes=limit)
    return pltpu.CompilerParams(dimension_semantics=sem)


def _choose_row_tile(n, preferred=256):
    """Pick a row-tile: prefer `preferred` (256 is MXU-native on v6e/v7x; use 128
    on v5e), else the largest multiple of 8 that divides n, else the full extent.
    NOTE: for very large n with no small divisor this falls back to the full
    extent — pad n to a multiple of 256 upstream in that case."""
    if n % preferred == 0:
        return preferred
    best = n
    t = 8
    while t <= min(n, preferred):
        if n % t == 0:
            best = t
        t += 8
    return best


def _row_spec(tile_n, d):
    return pl.BlockSpec((tile_n, d), lambda i: (i, 0))


def _const_spec(shape):
    return pl.BlockSpec(shape, lambda i: (0,) * len(shape))


def layernorm_p(x2d, gamma, beta, *, tile_n, eps=1e-6):
    n, d = x2d.shape
    cost = pl.CostEstimate(flops=int(8 * n * d), transcendentals=0,
                           bytes_accessed=int(2 * n * d * 4 + 2 * d * 4))
    return pl.pallas_call(
        partial(_layernorm_kernel, eps=eps),
        out_shape=jax.ShapeDtypeStruct((n, d), x2d.dtype),
        grid=(n // tile_n,),
        in_specs=[_row_spec(tile_n, d), _const_spec((1, d)), _const_spec((1, d))],
        out_specs=_row_spec(tile_n, d),
        compiler_params=_compiler_params(1, 4 * tile_n * d * 4),
        cost_estimate=cost,
    )(x2d, gamma.reshape(1, d), beta.reshape(1, d))


def mha_sublayer_p(x, attn_bias, p, n_heads, *, eps=1e-6):
    # x: (B, S, D); attn_bias: (B, 1, S) f32 additive key-padding bias.
    b, s, d = x.shape
    d3 = 3 * d
    dk = d // n_heads
    scale = 1.0 / math.sqrt(dk)

    w_bytes = (d * d3 + d * d) * 2 + (d3 + d) * 4 + 2 * d * 4           # bf16 W, f32 biases/LN
    act_bytes = s * d * 4 * 2 + s * d3 * 4 + n_heads * s * s * 4        # per-block rough upper bound
    flops = b * (2 * s * d * d3 + 4 * s * s * d + 2 * s * d * d)
    cost = pl.CostEstimate(flops=int(flops),
                           transcendentals=int(b * n_heads * s * s),
                           bytes_accessed=int(b * (2 * s * d * 4 + s * 4) + w_bytes))

    blk = pl.BlockSpec((1, s, d), lambda i: (i, 0, 0))
    bias_spec = pl.BlockSpec((1, 1, s), lambda i: (i, 0, 0))

    return pl.pallas_call(
        partial(_mha_sublayer_kernel, eps=eps, n_heads=n_heads, scale=scale),
        out_shape=jax.ShapeDtypeStruct((b, s, d), x.dtype),
        grid=(b,),
        in_specs=[blk,
                  _const_spec((1, d)), _const_spec((1, d)),
                  _const_spec((d, d3)), _const_spec((1, d3)),
                  _const_spec((d, d)), _const_spec((1, d)),
                  bias_spec],
        out_specs=blk,
        compiler_params=_compiler_params(1, 2 * (w_bytes + act_bytes)),
        cost_estimate=cost,
    )(x, p["ln1_g"].reshape(1, d), p["ln1_b"].reshape(1, d),
      p["wqkv"], p["bqkv"].reshape(1, d3),
      p["wo"], p["bo"].reshape(1, d),
      attn_bias)


def ln_ffn_residual_p(x2d, gamma, beta, w1, b1, w2, b2, *, tile_n, eps=1e-6):
    n, d = x2d.shape
    dff = w1.shape[1]
    w_bytes = (d * dff + dff * d) * 2 + (dff + d) * 4 + 2 * d * 4
    act_bytes = tile_n * (2 * d * 4 + dff * 4)
    cost = pl.CostEstimate(flops=int(4 * n * d * dff), transcendentals=0,
                           bytes_accessed=int(2 * n * d * 4 + w_bytes))
    return pl.pallas_call(
        partial(_ln_ffn_residual_kernel, eps=eps),
        out_shape=jax.ShapeDtypeStruct((n, d), x2d.dtype),
        grid=(n // tile_n,),
        in_specs=[_row_spec(tile_n, d),
                  _const_spec((1, d)), _const_spec((1, d)),
                  _const_spec((d, dff)), _const_spec((1, dff)),
                  _const_spec((dff, d)), _const_spec((1, d))],
        out_specs=_row_spec(tile_n, d),
        compiler_params=_compiler_params(1, 2 * (w_bytes + act_bytes)),
        cost_estimate=cost,
    )(x2d, gamma.reshape(1, d), beta.reshape(1, d),
      w1, b1.reshape(1, dff), w2, b2.reshape(1, d))


# ----------------------------------------------------------------------------
# Encoder assembly (glue is metadata-only reshapes; all math in Pallas kernels)
# ----------------------------------------------------------------------------

def encoder_layer(x, attn_bias, p, n_heads, tile_n):
    b, s, d = x.shape
    # --- Sublayer 1 (single fused kernel): LN -> QKV -> MHA -> Wo -> +residual ---
    x = mha_sublayer_p(x, attn_bias, p, n_heads)
    # --- Sublayer 2 (single fused kernel): LN -> FFN -> +residual ---
    x2 = ln_ffn_residual_p(x.reshape(b * s, d), p["ln2_g"], p["ln2_b"],
                           p["w1"], p["b1"], p["w2"], p["b2"], tile_n=tile_n)
    return x2.reshape(b, s, d)


def transformer_encoder(x, key_mask, params, n_heads):
    # x: (B, S, D); key_mask: (B, S) or (B, 1, S) key-padding mask, nonzero = attend.
    # Converted once to a tiny additive bias — the (B, S, S) mask is never materialized.
    b, s, d = x.shape
    n = b * s
    tile_n = _choose_row_tile(n)
    if key_mask.ndim == 3:
        key_mask = key_mask.reshape(b, s)
    attn_bias = jnp.where(key_mask == 0, jnp.float32(-1e9),
                          jnp.float32(0.0)).reshape(b, 1, s)
    for p in params["layers"]:
        x = encoder_layer(x, attn_bias, p, n_heads, tile_n)
    out = layernorm_p(x.reshape(n, d), params["norm_g"], params["norm_b"], tile_n=tile_n)
    return out.reshape(b, s, d)


# ----------------------------------------------------------------------------
# Deterministic parameter init (bf16 weights for the MXU path, f32 LN/bias)
# ----------------------------------------------------------------------------

def init_params(key, num_layers, d_model, d_ff):
    layers = []
    for li in range(num_layers):
        k = jax.random.fold_in(key, li)
        ks = jax.random.split(k, 6)
        scale = 0.02
        wq = scale * jax.random.normal(ks[0], (d_model, d_model), jnp.float32)
        wk = scale * jax.random.normal(ks[1], (d_model, d_model), jnp.float32)
        wv = scale * jax.random.normal(ks[2], (d_model, d_model), jnp.float32)
        layers.append(dict(
            wqkv=jnp.concatenate([wq, wk, wv], axis=1).astype(jnp.bfloat16),   # (D, 3D)
            bqkv=jnp.zeros((3 * d_model,), jnp.float32),
            wo=(scale * jax.random.normal(ks[3], (d_model, d_model), jnp.float32)
                ).astype(jnp.bfloat16),
            bo=jnp.zeros((d_model,), jnp.float32),
            w1=(scale * jax.random.normal(ks[4], (d_model, d_ff), jnp.float32)
                ).astype(jnp.bfloat16),
            b1=jnp.zeros((d_ff,), jnp.float32),
            w2=(scale * jax.random.normal(ks[5], (d_ff, d_model), jnp.float32)
                ).astype(jnp.bfloat16),
            b2=jnp.zeros((d_model,), jnp.float32),
            ln1_g=jnp.ones((d_model,), jnp.float32),
            ln1_b=jnp.zeros((d_model,), jnp.float32),
            ln2_g=jnp.ones((d_model,), jnp.float32),
            ln2_b=jnp.zeros((d_model,), jnp.float32),
        ))
    return dict(
        layers=layers,
        norm_g=jnp.ones((d_model,), jnp.float32),
        norm_b=jnp.zeros((d_model,), jnp.float32),
    )


# ----------------------------------------------------------------------------
# Main
# ----------------------------------------------------------------------------

if __name__ == "__main__":
    B, S, D = 2, 8, 32
    H, D_FF, NUM_LAYERS = 4, 64, 2

    key = jax.random.PRNGKey(0)
    kx, kp = jax.random.split(key)

    x = jax.random.normal(kx, (B, S, D), jnp.float32)

    # Key-padding mask: batch 0 attends to all 8 positions, batch 1 only to first 6.
    lengths = jnp.array([8, 6], dtype=jnp.int32)
    key_mask = (jnp.arange(S)[None, :] < lengths[:, None]).astype(jnp.int32)   # (B, S)

    params = init_params(kp, NUM_LAYERS, D, D_FF)

    fwd = jax.jit(partial(transformer_encoder, n_heads=H))
    out = fwd(x, key_mask, params)
    out = jax.block_until_ready(out)

    assert out.shape == (B, S, D) and out.dtype == jnp.float32
    assert bool(jnp.all(jnp.isfinite(out)))
    print("KERNEL_OK")
</pallas_src>

<mosaic_0001>
module attributes {stable_mosaic.version = 11 : i64} {
  func.func @_mha_sublayer_kernel(%arg0: i32, %arg1: memref<1x8x32xf32, #tpu.memory_space<vmem>>, %arg2: memref<1x32xf32, #tpu.memory_space<vmem>>, %arg3: memref<1x32xf32, #tpu.memory_space<vmem>>, %arg4: memref<32x96xbf16, #tpu.memory_space<vmem>>, %arg5: memref<1x96xf32, #tpu.memory_space<vmem>>, %arg6: memref<32x32xbf16, #tpu.memory_space<vmem>>, %arg7: memref<1x32xf32, #tpu.memory_space<vmem>>, %arg8: memref<1x1x8xf32, #tpu.memory_space<vmem>>, %arg9: memref<1x8x32xf32, #tpu.memory_space<vmem>>) attributes {dimension_semantics = [#tpu.dimension_semantics<parallel>], iteration_bounds = array<i64: 2>, scalar_prefetch = 0 : i64, scratch_operands = 0 : i64, tpu.core_type = #tpu.core_type<tc>, window_params = [{transform_indices = @transform_0, window_bounds = array<i64: 1, 8, 32>}, {pipeline_mode = #tpu.pipeline_mode<synchronous>, transform_indices = @transform_1, window_bounds = array<i64: 1, 32>}, {pipeline_mode = #tpu.pipeline_mode<synchronous>, transform_indices = @transform_2, window_bounds = array<i64: 1, 32>}, {pipeline_mode = #tpu.pipeline_mode<synchronous>, transform_indices = @transform_3, window_bounds = array<i64: 32, 96>}, {pipeline_mode = #tpu.pipeline_mode<synchronous>, transform_indices = @transform_4, window_bounds = array<i64: 1, 96>}, {pipeline_mode = #tpu.pipeline_mode<synchronous>, transform_indices = @transform_5, window_bounds = array<i64: 32, 32>}, {pipeline_mode = #tpu.pipeline_mode<synchronous>, transform_indices = @transform_6, window_bounds = array<i64: 1, 32>}, {transform_indices = @transform_7, window_bounds = array<i64: 1, 1, 8>}, {transform_indices = @transform_8, window_bounds = array<i64: 1, 8, 32>}]} {
    %c0 = arith.constant 0 : index
    %c0_0 = arith.constant 0 : index
    %c0_1 = arith.constant 0 : index
    %0 = vector.load %arg1[%c0, %c0_0, %c0_1] : memref<1x8x32xf32, #tpu.memory_space<vmem>>, vector<1x8x32xf32>
    %1 = vector.shape_cast %0 : vector<1x8x32xf32> to vector<8x32xf32>
    %c0_2 = arith.constant 0 : index
    %c0_3 = arith.constant 0 : index
    %2 = vector.load %arg2[%c0_2, %c0_3] : memref<1x32xf32, #tpu.memory_space<vmem>>, vector<1x32xf32>
    %c0_4 = arith.constant 0 : index
    %c0_5 = arith.constant 0 : index
    %3 = vector.load %arg3[%c0_4, %c0_5] : memref<1x32xf32, #tpu.memory_space<vmem>>, vector<1x32xf32>
    %cst = arith.constant dense<0.000000e+00> : vector<8xf32>
    %4 = vector.multi_reduction <add>, %1, %cst [1] : vector<8x32xf32> to vector<8xf32>
    %5 = vector.shape_cast %4 : vector<8xf32> to vector<8x1xf32>
    %cst_6 = arith.constant 3.200000e+01 : f32
    %6 = vector.broadcast %cst_6 : f32 to vector<8x1xf32>
    %7 = arith.divf %5, %6 : vector<8x1xf32>
    %8 = vector.broadcast %7 : vector<8x1xf32> to vector<8x32xf32>
    %9 = arith.subf %1, %8 : vector<8x32xf32>
    %10 = arith.mulf %9, %9 : vector<8x32xf32>
    %cst_7 = arith.constant dense<0.000000e+00> : vector<8xf32>
    %11 = vector.multi_reduction <add>, %10, %cst_7 [1] : vector<8x32xf32> to vector<8xf32>
    %12 = vector.shape_cast %11 : vector<8xf32> to vector<8x1xf32>
    %cst_8 = arith.constant 3.100000e+01 : f32
    %13 = vector.broadcast %cst_8 : f32 to vector<8x1xf32>
    %14 = arith.divf %12, %13 : vector<8x1xf32>
    %15 = math.sqrt %14 : vector<8x1xf32>
    %16 = vector.broadcast %7 : vector<8x1xf32> to vector<8x32xf32>
    %17 = arith.subf %1, %16 : vector<8x32xf32>
    %18 = vector.broadcast %2 : vector<1x32xf32> to vector<8x32xf32>
    %19 = arith.mulf %18, %17 : vector<8x32xf32>
    %cst_9 = arith.constant 9.99999997E-7 : f32
    %20 = vector.broadcast %cst_9 : f32 to vector<8x1xf32>
    %21 = arith.addf %15, %20 : vector<8x1xf32>
    %22 = vector.broadcast %21 : vector<8x1xf32> to vector<8x32xf32>
    %23 = arith.divf %19, %22 : vector<8x32xf32>
    %24 = vector.broadcast %3 : vector<1x32xf32> to vector<8x32xf32>
    %25 = arith.addf %23, %24 : vector<8x32xf32>
    %26 = arith.truncf %25 : vector<8x32xf32> to vector<8x32xbf16>
    %c0_10 = arith.constant 0 : index
    %c0_11 = arith.constant 0 : index
    %27 = vector.load %arg4[%c0_10, %c0_11] : memref<32x96xbf16, #tpu.memory_space<vmem>>, vector<32x96xbf16>
    %cst_12 = arith.constant dense<0.000000e+00> : vector<8x96xf32>
    %28 = tpu.matmul %26, %27, %cst_12 {dimension_numbers = #tpu.dot_dimension_numbers<[1], [0], [0], [1], [0, 0, 1, 1], [], []>} : vector<8x32xbf16>, vector<32x96xbf16>, vector<8x96xf32> -> vector<8x96xf32>
    %c0_13 = arith.constant 0 : index
    %c0_14 = arith.constant 0 : index
    %29 = vector.load %arg5[%c0_13, %c0_14] : memref<1x96xf32, #tpu.memory_space<vmem>>, vector<1x96xf32>
    %30 = vector.broadcast %29 : vector<1x96xf32> to vector<8x96xf32>
    %31 = arith.addf %28, %30 : vector<8x96xf32>
    %c0_15 = arith.constant 0 : index
    %c0_16 = arith.constant 0 : index
    %c0_17 = arith.constant 0 : index
    %32 = vector.load %arg8[%c0_15, %c0_16, %c0_17] : memref<1x1x8xf32, #tpu.memory_space<vmem>>, vector<1x1x8xf32>
    %33 = vector.shape_cast %32 : vector<1x1x8xf32> to vector<1x8xf32>
    %34 = vector.extract_strided_slice %31 {offsets = [0, 0], sizes = [8, 8], strides = [1, 1]} : vector<8x96xf32> to vector<8x8xf32>
    %35 = arith.truncf %34 : vector<8x8xf32> to vector<8x8xbf16>
    %36 = vector.extract_strided_slice %31 {offsets = [0, 32], sizes = [8, 8], strides = [1, 1]} : vector<8x96xf32> to vector<8x8xf32>
    %37 = arith.truncf %36 : vector<8x8xf32> to vector<8x8xbf16>
    %38 = vector.extract_strided_slice %31 {offsets = [0, 64], sizes = [8, 8], strides = [1, 1]} : vector<8x96xf32> to vector<8x8xf32>
    %39 = arith.truncf %38 : vector<8x8xf32> to vector<8x8xbf16>
    %cst_18 = arith.constant dense<0.000000e+00> : vector<8x8xf32>
    %40 = tpu.matmul %35, %37, %cst_18 {dimension_numbers = #tpu.dot_dimension_numbers<[1], [1], [0], [0], [0, 0, 1, 0], [], []>} : vector<8x8xbf16>, vector<8x8xbf16>, vector<8x8xf32> -> vector<8x8xf32>
    %cst_19 = arith.constant 0.353553385 : f32
    %41 = vector.broadcast %cst_19 : f32 to vector<8x8xf32>
    %42 = arith.mulf %40, %41 : vector<8x8xf32>
    %43 = vector.broadcast %33 : vector<1x8xf32> to vector<8x8xf32>
    %44 = arith.addf %42, %43 : vector<8x8xf32>
    %cst_20 = arith.constant dense<0xFF800000> : vector<8xf32>
    %45 = vector.multi_reduction <maximumf>, %44, %cst_20 [1] : vector<8x8xf32> to vector<8xf32>
    %46 = vector.shape_cast %45 : vector<8xf32> to vector<8x1xf32>
    %47 = vector.broadcast %46 : vector<8x1xf32> to vector<8x8xf32>
    %48 = arith.subf %44, %47 : vector<8x8xf32>
    %49 = math.exp %48 : vector<8x8xf32>
    %cst_21 = arith.constant dense<0.000000e+00> : vector<8xf32>
    %50 = vector.multi_reduction <add>, %49, %cst_21 [1] : vector<8x8xf32> to vector<8xf32>
    %51 = vector.shape_cast %50 : vector<8xf32> to vector<8x1xf32>
    %52 = tpu.reciprocal %51 {approx = true} : vector<8x1xf32> -> vector<8x1xf32>
    %53 = vector.broadcast %52 : vector<8x1xf32> to vector<8x8xf32>
    %54 = arith.mulf %49, %53 : vector<8x8xf32>
    %55 = arith.truncf %54 : vector<8x8xf32> to vector<8x8xbf16>
    %cst_22 = arith.constant dense<0.000000e+00> : vector<8x8xf32>
    %56 = tpu.matmul %55, %39, %cst_22 {dimension_numbers = #tpu.dot_dimension_numbers<[1], [0], [0], [1], [0, 0, 1, 1], [], []>} : vector<8x8xbf16>, vector<8x8xbf16>, vector<8x8xf32> -> vector<8x8xf32>
    %57 = vector.extract_strided_slice %31 {offsets = [0, 8], sizes = [8, 8], strides = [1, 1]} : vector<8x96xf32> to vector<8x8xf32>
    %58 = arith.truncf %57 : vector<8x8xf32> to vector<8x8xbf16>
    %59 = vector.extract_strided_slice %31 {offsets = [0, 40], sizes = [8, 8], strides = [1, 1]} : vector<8x96xf32> to vector<8x8xf32>
    %60 = arith.truncf %59 : vector<8x8xf32> to vector<8x8xbf16>
    %61 = vector.extract_strided_slice %31 {offsets = [0, 72], sizes = [8, 8], strides = [1, 1]} : vector<8x96xf32> to vector<8x8xf32>
    %62 = arith.truncf %61 : vector<8x8xf32> to vector<8x8xbf16>
    %cst_23 = arith.constant dense<0.000000e+00> : vector<8x8xf32>
    %63 = tpu.matmul %58, %60, %cst_23 {dimension_numbers = #tpu.dot_dimension_numbers<[1], [1], [0], [0], [0, 0, 1, 0], [], []>} : vector<8x8xbf16>, vector<8x8xbf16>, vector<8x8xf32> -> vector<8x8xf32>
    %cst_24 = arith.constant 0.353553385 : f32
    %64 = vector.broadcast %cst_24 : f32 to vector<8x8xf32>
    %65 = arith.mulf %63, %64 : vector<8x8xf32>
    %66 = vector.broadcast %33 : vector<1x8xf32> to vector<8x8xf32>
    %67 = arith.addf %65, %66 : vector<8x8xf32>
    %cst_25 = arith.constant dense<0xFF800000> : vector<8xf32>
    %68 = vector.multi_reduction <maximumf>, %67, %cst_25 [1] : vector<8x8xf32> to vector<8xf32>
    %69 = vector.shape_cast %68 : vector<8xf32> to vector<8x1xf32>
    %70 = vector.broadcast %69 : vector<8x1xf32> to vector<8x8xf32>
    %71 = arith.subf %67, %70 : vector<8x8xf32>
    %72 = math.exp %71 : vector<8x8xf32>
    %cst_26 = arith.constant dense<0.000000e+00> : vector<8xf32>
    %73 = vector.multi_reduction <add>, %72, %cst_26 [1] : vector<8x8xf32> to vector<8xf32>
    %74 = vector.shape_cast %73 : vector<8xf32> to vector<8x1xf32>
    %75 = tpu.reciprocal %74 {approx = true} : vector<8x1xf32> -> vector<8x1xf32>
    %76 = vector.broadcast %75 : vector<8x1xf32> to vector<8x8xf32>
    %77 = arith.mulf %72, %76 : vector<8x8xf32>
    %78 = arith.truncf %77 : vector<8x8xf32> to vector<8x8xbf16>
    %cst_27 = arith.constant dense<0.000000e+00> : vector<8x8xf32>
    %79 = tpu.matmul %78, %62, %cst_27 {dimension_numbers = #tpu.dot_dimension_numbers<[1], [0], [0], [1], [0, 0, 1, 1], [], []>} : vector<8x8xbf16>, vector<8x8xbf16>, vector<8x8xf32> -> vector<8x8xf32>
    %80 = vector.extract_strided_slice %31 {offsets = [0, 16], sizes = [8, 8], strides = [1, 1]} : vector<8x96xf32> to vector<8x8xf32>
    %81 = arith.truncf %80 : vector<8x8xf32> to vector<8x8xbf16>
    %82 = vector.extract_strided_slice %31 {offsets = [0, 48], sizes = [8, 8], strides = [1, 1]} : vector<8x96xf32> to vector<8x8xf32>
    %83 = arith.truncf %82 : vector<8x8xf32> to vector<8x8xbf16>
    %84 = vector.extract_strided_slice %31 {offsets = [0, 80], sizes = [8, 8], strides = [1, 1]} : vector<8x96xf32> to vector<8x8xf32>
    %85 = arith.truncf %84 : vector<8x8xf32> to vector<8x8xbf16>
    %cst_28 = arith.constant dense<0.000000e+00> : vector<8x8xf32>
    %86 = tpu.matmul %81, %83, %cst_28 {dimension_numbers = #tpu.dot_dimension_numbers<[1], [1], [0], [0], [0, 0, 1, 0], [], []>} : vector<8x8xbf16>, vector<8x8xbf16>, vector<8x8xf32> -> vector<8x8xf32>
    %cst_29 = arith.constant 0.353553385 : f32
    %87 = vector.broadcast %cst_29 : f32 to vector<8x8xf32>
    %88 = arith.mulf %86, %87 : vector<8x8xf32>
    %89 = vector.broadcast %33 : vector<1x8xf32> to vector<8x8xf32>
    %90 = arith.addf %88, %89 : vector<8x8xf32>
    %cst_30 = arith.constant dense<0xFF800000> : vector<8xf32>
    %91 = vector.multi_reduction <maximumf>, %90, %cst_30 [1] : vector<8x8xf32> to vector<8xf32>
    %92 = vector.shape_cast %91 : vector<8xf32> to vector<8x1xf32>
    %93 = vector.broadcast %92 : vector<8x1xf32> to vector<8x8xf32>
    %94 = arith.subf %90, %93 : vector<8x8xf32>
    %95 = math.exp %94 : vector<8x8xf32>
    %cst_31 = arith.constant dense<0.000000e+00> : vector<8xf32>
    %96 = vector.multi_reduction <add>, %95, %cst_31 [1] : vector<8x8xf32> to vector<8xf32>
    %97 = vector.shape_cast %96 : vector<8xf32> to vector<8x1xf32>
    %98 = tpu.reciprocal %97 {approx = true} : vector<8x1xf32> -> vector<8x1xf32>
    %99 = vector.broadcast %98 : vector<8x1xf32> to vector<8x8xf32>
    %100 = arith.mulf %95, %99 : vector<8x8xf32>
    %101 = arith.truncf %100 : vector<8x8xf32> to vector<8x8xbf16>
    %cst_32 = arith.constant dense<0.000000e+00> : vector<8x8xf32>
    %102 = tpu.matmul %101, %85, %cst_32 {dimension_numbers = #tpu.dot_dimension_numbers<[1], [0], [0], [1], [0, 0, 1, 1], [], []>} : vector<8x8xbf16>, vector<8x8xbf16>, vector<8x8xf32> -> vector<8x8xf32>
    %103 = vector.extract_strided_slice %31 {offsets = [0, 24], sizes = [8, 8], strides = [1, 1]} : vector<8x96xf32> to vector<8x8xf32>
    %104 = arith.truncf %103 : vector<8x8xf32> to vector<8x8xbf16>
    %105 = vector.extract_strided_slice %31 {offsets = [0, 56], sizes = [8, 8], strides = [1, 1]} : vector<8x96xf32> to vector<8x8xf32>
    %106 = arith.truncf %105 : vector<8x8xf32> to vector<8x8xbf16>
    %107 = vector.extract_strided_slice %31 {offsets = [0, 88], sizes = [8, 8], strides = [1, 1]} : vector<8x96xf32> to vector<8x8xf32>
    %108 = arith.truncf %107 : vector<8x8xf32> to vector<8x8xbf16>
    %cst_33 = arith.constant dense<0.000000e+00> : vector<8x8xf32>
    %109 = tpu.matmul %104, %106, %cst_33 {dimension_numbers = #tpu.dot_dimension_numbers<[1], [1], [0], [0], [0, 0, 1, 0], [], []>} : vector<8x8xbf16>, vector<8x8xbf16>, vector<8x8xf32> -> vector<8x8xf32>
    %cst_34 = arith.constant 0.353553385 : f32
    %110 = vector.broadcast %cst_34 : f32 to vector<8x8xf32>
    %111 = arith.mulf %109, %110 : vector<8x8xf32>
    %112 = vector.broadcast %33 : vector<1x8xf32> to vector<8x8xf32>
    %113 = arith.addf %111, %112 : vector<8x8xf32>
    %cst_35 = arith.constant dense<0xFF800000> : vector<8xf32>
    %114 = vector.multi_reduction <maximumf>, %113, %cst_35 [1] : vector<8x8xf32> to vector<8xf32>
    %115 = vector.shape_cast %114 : vector<8xf32> to vector<8x1xf32>
    %116 = vector.broadcast %115 : vector<8x1xf32> to vector<8x8xf32>
    %117 = arith.subf %113, %116 : vector<8x8xf32>
    %118 = math.exp %117 : vector<8x8xf32>
    %cst_36 = arith.constant dense<0.000000e+00> : vector<8xf32>
    %119 = vector.multi_reduction <add>, %118, %cst_36 [1] : vector<8x8xf32> to vector<8xf32>
    %120 = vector.shape_cast %119 : vector<8xf32> to vector<8x1xf32>
    %121 = tpu.reciprocal %120 {approx = true} : vector<8x1xf32> -> vector<8x1xf32>
    %122 = vector.broadcast %121 : vector<8x1xf32> to vector<8x8xf32>
    %123 = arith.mulf %118, %122 : vector<8x8xf32>
    %124 = arith.truncf %123 : vector<8x8xf32> to vector<8x8xbf16>
    %cst_37 = arith.constant dense<0.000000e+00> : vector<8x8xf32>
    %125 = tpu.matmul %124, %108, %cst_37 {dimension_numbers = #tpu.dot_dimension_numbers<[1], [0], [0], [1], [0, 0, 1, 1], [], []>} : vector<8x8xbf16>, vector<8x8xbf16>, vector<8x8xf32> -> vector<8x8xf32>
    %126 = tpu.concatenate %56, %79, %102, %125 in 1 : vector<8x8xf32>, vector<8x8xf32>, vector<8x8xf32>, vector<8x8xf32> -> vector<8x32xf32>
    %127 = arith.truncf %126 : vector<8x32xf32> to vector<8x32xbf16>
    %c0_38 = arith.constant 0 : index
    %c0_39 = arith.constant 0 : index
    %128 = vector.load %arg6[%c0_38, %c0_39] : memref<32x32xbf16, #tpu.memory_space<vmem>>, vector<32x32xbf16>
    %cst_40 = arith.constant dense<0.000000e+00> : vector<8x32xf32>
    %129 = tpu.matmul %127, %128, %cst_40 {dimension_numbers = #tpu.dot_dimension_numbers<[1], [0], [0], [1], [0, 0, 1, 1], [], []>} : vector<8x32xbf16>, vector<32x32xbf16>, vector<8x32xf32> -> vector<8x32xf32>
    %c0_41 = arith.constant 0 : index
    %c0_42 = arith.constant 0 : index
    %130 = vector.load %arg7[%c0_41, %c0_42] : memref<1x32xf32, #tpu.memory_space<vmem>>, vector<1x32xf32>
    %131 = vector.broadcast %130 : vector<1x32xf32> to vector<8x32xf32>
    %132 = arith.addf %129, %131 : vector<8x32xf32>
    %133 = arith.addf %1, %132 : vector<8x32xf32>
    %c0_43 = arith.constant 0 : index
    %c0_44 = arith.constant 0 : index
    %c0_45 = arith.constant 0 : index
    %134 = vector.load %arg9[%c0_43, %c0_44, %c0_45] : memref<1x8x32xf32, #tpu.memory_space<vmem>>, vector<1x8x32xf32>
    %135 = vector.shape_cast %134 : vector<1x8x32xf32> to vector<8x32xf32>
    %136 = vector.shape_cast %133 : vector<8x32xf32> to vector<1x8x32xf32>
    tpu.vector_store %arg9[%c0_43, %c0_44, %c0_45], %136 {strides = array<i32>} : memref<1x8x32xf32, #tpu.memory_space<vmem>>, vector<1x8x32xf32>,
    return
  }
  func.func @transform_0(%arg0: i32) -> (i32, i32, i32) {
    %c0_i32 = arith.constant 0 : i32
    %c0_i32_0 = arith.constant 0 : i32
    %c0_i32_1 = arith.constant 0 : i32
    return %arg0, %c0_i32, %c0_i32_0 : i32, i32, i32
  }
  func.func @transform_1(%arg0: i32) -> (i32, i32) {
    %c0_i32 = arith.constant 0 : i32
    %c0_i32_0 = arith.constant 0 : i32
    %c0_i32_1 = arith.constant 0 : i32
    return %c0_i32, %c0_i32_0 : i32, i32
  }
  func.func @transform_2(%arg0: i32) -> (i32, i32) {
    %c0_i32 = arith.constant 0 : i32
    %c0_i32_0 = arith.constant 0 : i32
    %c0_i32_1 = arith.constant 0 : i32
    return %c0_i32, %c0_i32_0 : i32, i32
  }
  func.func @transform_3(%arg0: i32) -> (i32, i32) {
    %c0_i32 = arith.constant 0 : i32
    %c0_i32_0 = arith.constant 0 : i32
    %c0_i32_1 = arith.constant 0 : i32
    return %c0_i32, %c0_i32_0 : i32, i32
  }
  func.func @transform_4(%arg0: i32) -> (i32, i32) {
    %c0_i32 = arith.constant 0 : i32
    %c0_i32_0 = arith.constant 0 : i32
    %c0_i32_1 = arith.constant 0 : i32
    return %c0_i32, %c0_i32_0 : i32, i32
  }
  func.func @transform_5(%arg0: i32) -> (i32, i32) {
    %c0_i32 = arith.constant 0 : i32
    %c0_i32_0 = arith.constant 0 : i32
    %c0_i32_1 = arith.constant 0 : i32
    return %c0_i32, %c0_i32_0 : i32, i32
  }
  func.func @transform_6(%arg0: i32) -> (i32, i32) {
    %c0_i32 = arith.constant 0 : i32
    %c0_i32_0 = arith.constant 0 : i32
    %c0_i32_1 = arith.constant 0 : i32
    return %c0_i32, %c0_i32_0 : i32, i32
  }
  func.func @transform_7(%arg0: i32) -> (i32, i32, i32) {
    %c0_i32 = arith.constant 0 : i32
    %c0_i32_0 = arith.constant 0 : i32
    %c0_i32_1 = arith.constant 0 : i32
    return %arg0, %c0_i32, %c0_i32_0 : i32, i32, i32
  }
  func.func @transform_8(%arg0: i32) -> (i32, i32, i32) {
    %c0_i32 = arith.constant 0 : i32
    %c0_i32_0 = arith.constant 0 : i32
    %c0_i32_1 = arith.constant 0 : i32
    return %arg0, %c0_i32, %c0_i32_0 : i32, i32, i32
  }
}

module attributes {stable_mosaic.version = 11 : i64} {
  func.func @_ln_ffn_residual_kernel(%arg0: i32, %arg1: memref<16x32xf32, #tpu.memory_space<vmem>>, %arg2: memref<1x32xf32, #tpu.memory_space<vmem>>, %arg3: memref<1x32xf32, #tpu.memory_space<vmem>>, %arg4: memref<32x64xbf16, #tpu.memory_space<vmem>>, %arg5: memref<1x64xf32, #tpu.memory_space<vmem>>, %arg6: memref<64x32xbf16, #tpu.memory_space<vmem>>, %arg7: memref<1x32xf32, #tpu.memory_space<vmem>>, %arg8: memref<16x32xf32, #tpu.memory_space<vmem>>) attributes {dimension_semantics = [#tpu.dimension_semantics<parallel>], iteration_bounds = array<i64: 1>, scalar_prefetch = 0 : i64, scratch_operands = 0 : i64, tpu.core_type = #tpu.core_type<tc>, window_params = [{transform_indices = @transform_0, window_bounds = array<i64: 16, 32>}, {pipeline_mode = #tpu.pipeline_mode<synchronous>, transform_indices = @transform_1, window_bounds = array<i64: 1, 32>}, {pipeline_mode = #tpu.pipeline_mode<synchronous>, transform_indices = @transform_2, window_bounds = array<i64: 1, 32>}, {pipeline_mode = #tpu.pipeline_mode<synchronous>, transform_indices = @transform_3, window_bounds = array<i64: 32, 64>}, {pipeline_mode = #tpu.pipeline_mode<synchronous>, transform_indices = @transform_4, window_bounds = array<i64: 1, 64>}, {pipeline_mode = #tpu.pipeline_mode<synchronous>, transform_indices = @transform_5, window_bounds = array<i64: 64, 32>}, {pipeline_mode = #tpu.pipeline_mode<synchronous>, transform_indices = @transform_6, window_bounds = array<i64: 1, 32>}, {transform_indices = @transform_7, window_bounds = array<i64: 16, 32>}]} {
    %c0 = arith.constant 0 : index
    %c0_0 = arith.constant 0 : index
    %0 = vector.load %arg1[%c0, %c0_0] : memref<16x32xf32, #tpu.memory_space<vmem>>, vector<16x32xf32>
    %c0_1 = arith.constant 0 : index
    %c0_2 = arith.constant 0 : index
    %1 = vector.load %arg2[%c0_1, %c0_2] : memref<1x32xf32, #tpu.memory_space<vmem>>, vector<1x32xf32>
    %c0_3 = arith.constant 0 : index
    %c0_4 = arith.constant 0 : index
    %2 = vector.load %arg3[%c0_3, %c0_4] : memref<1x32xf32, #tpu.memory_space<vmem>>, vector<1x32xf32>
    %cst = arith.constant dense<0.000000e+00> : vector<16xf32>
    %3 = vector.multi_reduction <add>, %0, %cst [1] : vector<16x32xf32> to vector<16xf32>
    %4 = vector.shape_cast %3 : vector<16xf32> to vector<16x1xf32>
    %cst_5 = arith.constant 3.200000e+01 : f32
    %5 = vector.broadcast %cst_5 : f32 to vector<16x1xf32>
    %6 = arith.divf %4, %5 : vector<16x1xf32>
    %7 = vector.broadcast %6 : vector<16x1xf32> to vector<16x32xf32>
    %8 = arith.subf %0, %7 : vector<16x32xf32>
    %9 = arith.mulf %8, %8 : vector<16x32xf32>
    %cst_6 = arith.constant dense<0.000000e+00> : vector<16xf32>
    %10 = vector.multi_reduction <add>, %9, %cst_6 [1] : vector<16x32xf32> to vector<16xf32>
    %11 = vector.shape_cast %10 : vector<16xf32> to vector<16x1xf32>
    %cst_7 = arith.constant 3.100000e+01 : f32
    %12 = vector.broadcast %cst_7 : f32 to vector<16x1xf32>
    %13 = arith.divf %11, %12 : vector<16x1xf32>
    %14 = math.sqrt %13 : vector<16x1xf32>
    %15 = vector.broadcast %6 : vector<16x1xf32> to vector<16x32xf32>
    %16 = arith.subf %0, %15 : vector<16x32xf32>
    %17 = vector.broadcast %1 : vector<1x32xf32> to vector<16x32xf32>
    %18 = arith.mulf %17, %16 : vector<16x32xf32>
    %cst_8 = arith.constant 9.99999997E-7 : f32
    %19 = vector.broadcast %cst_8 : f32 to vector<16x1xf32>
    %20 = arith.addf %14, %19 : vector<16x1xf32>
    %21 = vector.broadcast %20 : vector<16x1xf32> to vector<16x32xf32>
    %22 = arith.divf %18, %21 : vector<16x32xf32>
    %23 = vector.broadcast %2 : vector<1x32xf32> to vector<16x32xf32>
    %24 = arith.addf %22, %23 : vector<16x32xf32>
    %25 = arith.truncf %24 : vector<16x32xf32> to vector<16x32xbf16>
    %c0_9 = arith.constant 0 : index
    %c0_10 = arith.constant 0 : index
    %26 = vector.load %arg4[%c0_9, %c0_10] : memref<32x64xbf16, #tpu.memory_space<vmem>>, vector<32x64xbf16>
    %cst_11 = arith.constant dense<0.000000e+00> : vector<16x64xf32>
    %27 = tpu.matmul %25, %26, %cst_11 {dimension_numbers = #tpu.dot_dimension_numbers<[1], [0], [0], [1], [0, 0, 1, 1], [], []>} : vector<16x32xbf16>, vector<32x64xbf16>, vector<16x64xf32> -> vector<16x64xf32>
    %c0_12 = arith.constant 0 : index
    %c0_13 = arith.constant 0 : index
    %28 = vector.load %arg5[%c0_12, %c0_13] : memref<1x64xf32, #tpu.memory_space<vmem>>, vector<1x64xf32>
    %29 = vector.broadcast %28 : vector<1x64xf32> to vector<16x64xf32>
    %30 = arith.addf %27, %29 : vector<16x64xf32>
    %cst_14 = arith.constant 0.000000e+00 : f32
    %31 = vector.broadcast %cst_14 : f32 to vector<16x64xf32>
    %32 = arith.maximumf %30, %31 : vector<16x64xf32>
    %33 = arith.truncf %32 : vector<16x64xf32> to vector<16x64xbf16>
    %c0_15 = arith.constant 0 : index
    %c0_16 = arith.constant 0 : index
    %34 = vector.load %arg6[%c0_15, %c0_16] : memref<64x32xbf16, #tpu.memory_space<vmem>>, vector<64x32xbf16>
    %cst_17 = arith.constant dense<0.000000e+00> : vector<16x32xf32>
    %35 = tpu.matmul %33, %34, %cst_17 {dimension_numbers = #tpu.dot_dimension_numbers<[1], [0], [0], [1], [0, 0, 1, 1], [], []>} : vector<16x64xbf16>, vector<64x32xbf16>, vector<16x32xf32> -> vector<16x32xf32>
    %c0_18 = arith.constant 0 : index
    %c0_19 = arith.constant 0 : index
    %36 = vector.load %arg7[%c0_18, %c0_19] : memref<1x32xf32, #tpu.memory_space<vmem>>, vector<1x32xf32>
    %37 = vector.broadcast %36 : vector<1x32xf32> to vector<16x32xf32>
    %38 = arith.addf %35, %37 : vector<16x32xf32>
    %39 = arith.addf %0, %38 : vector<16x32xf32>
    %c0_20 = arith.constant 0 : index
    %c0_21 = arith.constant 0 : index
    %40 = vector.load %arg8[%c0_20, %c0_21] : memref<16x32xf32, #tpu.memory_space<vmem>>, vector<16x32xf32>
    tpu.vector_store %arg8[%c0_20, %c0_21], %39 {strides = array<i32>} : memref<16x32xf32, #tpu.memory_space<vmem>>, vector<16x32xf32>,
    return
  }
  func.func @transform_0(%arg0: i32) -> (i32, i32) {
    %c0_i32 = arith.constant 0 : i32
    %c0_i32_0 = arith.constant 0 : i32
    return %arg0, %c0_i32 : i32, i32
  }
  func.func @transform_1(%arg0: i32) -> (i32, i32) {
    %c0_i32 = arith.constant 0 : i32
    %c0_i32_0 = arith.constant 0 : i32
    %c0_i32_1 = arith.constant 0 : i32
    return %c0_i32, %c0_i32_0 : i32, i32
  }
  func.func @transform_2(%arg0: i32) -> (i32, i32) {
    %c0_i32 = arith.constant 0 : i32
    %c0_i32_0 = arith.constant 0 : i32
    %c0_i32_1 = arith.constant 0 : i32
    return %c0_i32, %c0_i32_0 : i32, i32
  }
  func.func @transform_3(%arg0: i32) -> (i32, i32) {
    %c0_i32 = arith.constant 0 : i32
    %c0_i32_0 = arith.constant 0 : i32
    %c0_i32_1 = arith.constant 0 : i32
    return %c0_i32, %c0_i32_0 : i32, i32
  }
  func.func @transform_4(%arg0: i32) -> (i32, i32) {
    %c0_i32 = arith.constant 0 : i32
    %c0_i32_0 = arith.constant 0 : i32
    %c0_i32_1 = arith.constant 0 : i32
    return %c0_i32, %c0_i32_0 : i32, i32
  }
  func.func @transform_5(%arg0: i32) -> (i32, i32) {
    %c0_i32 = arith.constant 0 : i32
    %c0_i32_0 = arith.constant 0 : i32
    %c0_i32_1 = arith.constant 0 : i32
    return %c0_i32, %c0_i32_0 : i32, i32
  }
  func.func @transform_6(%arg0: i32) -> (i32, i32) {
    %c0_i32 = arith.constant 0 : i32
    %c0_i32_0 = arith.constant 0 : i32
    %c0_i32_1 = arith.constant 0 : i32
    return %c0_i32, %c0_i32_0 : i32, i32
  }
  func.func @transform_7(%arg0: i32) -> (i32, i32) {
    %c0_i32 = arith.constant 0 : i32
    %c0_i32_0 = arith.constant 0 : i32
    return %arg0, %c0_i32 : i32, i32
  }
}

module attributes {stable_mosaic.version = 11 : i64} {
  func.func @_layernorm_kernel(%arg0: i32, %arg1: memref<16x32xf32, #tpu.memory_space<vmem>>, %arg2: memref<1x32xf32, #tpu.memory_space<vmem>>, %arg3: memref<1x32xf32, #tpu.memory_space<vmem>>, %arg4: memref<16x32xf32, #tpu.memory_space<vmem>>) attributes {dimension_semantics = [#tpu.dimension_semantics<parallel>], iteration_bounds = array<i64: 1>, scalar_prefetch = 0 : i64, scratch_operands = 0 : i64, tpu.core_type = #tpu.core_type<tc>, window_params = [{transform_indices = @transform_0, window_bounds = array<i64: 16, 32>}, {pipeline_mode = #tpu.pipeline_mode<synchronous>, transform_indices = @transform_1, window_bounds = array<i64: 1, 32>}, {pipeline_mode = #tpu.pipeline_mode<synchronous>, transform_indices = @transform_2, window_bounds = array<i64: 1, 32>}, {transform_indices = @transform_3, window_bounds = array<i64: 16, 32>}]} {
    %c0 = arith.constant 0 : index
    %c0_0 = arith.constant 0 : index
    %0 = vector.load %arg1[%c0, %c0_0] : memref<16x32xf32, #tpu.memory_space<vmem>>, vector<16x32xf32>
    %c0_1 = arith.constant 0 : index
    %c0_2 = arith.constant 0 : index
    %1 = vector.load %arg2[%c0_1, %c0_2] : memref<1x32xf32, #tpu.memory_space<vmem>>, vector<1x32xf32>
    %c0_3 = arith.constant 0 : index
    %c0_4 = arith.constant 0 : index
    %2 = vector.load %arg3[%c0_3, %c0_4] : memref<1x32xf32, #tpu.memory_space<vmem>>, vector<1x32xf32>
    %cst = arith.constant dense<0.000000e+00> : vector<16xf32>
    %3 = vector.multi_reduction <add>, %0, %cst [1] : vector<16x32xf32> to vector<16xf32>
    %4 = vector.shape_cast %3 : vector<16xf32> to vector<16x1xf32>
    %cst_5 = arith.constant 3.200000e+01 : f32
    %5 = vector.broadcast %cst_5 : f32 to vector<16x1xf32>
    %6 = arith.divf %4, %5 : vector<16x1xf32>
    %7 = vector.broadcast %6 : vector<16x1xf32> to vector<16x32xf32>
    %8 = arith.subf %0, %7 : vector<16x32xf32>
    %9 = arith.mulf %8, %8 : vector<16x32xf32>
    %cst_6 = arith.constant dense<0.000000e+00> : vector<16xf32>
    %10 = vector.multi_reduction <add>, %9, %cst_6 [1] : vector<16x32xf32> to vector<16xf32>
    %11 = vector.shape_cast %10 : vector<16xf32> to vector<16x1xf32>
    %cst_7 = arith.constant 3.100000e+01 : f32
    %12 = vector.broadcast %cst_7 : f32 to vector<16x1xf32>
    %13 = arith.divf %11, %12 : vector<16x1xf32>
    %14 = math.sqrt %13 : vector<16x1xf32>
    %15 = vector.broadcast %6 : vector<16x1xf32> to vector<16x32xf32>
    %16 = arith.subf %0, %15 : vector<16x32xf32>
    %17 = vector.broadcast %1 : vector<1x32xf32> to vector<16x32xf32>
    %18 = arith.mulf %17, %16 : vector<16x32xf32>
    %cst_8 = arith.constant 9.99999997E-7 : f32
    %19 = vector.broadcast %cst_8 : f32 to vector<16x1xf32>
    %20 = arith.addf %14, %19 : vector<16x1xf32>
    %21 = vector.broadcast %20 : vector<16x1xf32> to vector<16x32xf32>
    %22 = arith.divf %18, %21 : vector<16x32xf32>
    %23 = vector.broadcast %2 : vector<1x32xf32> to vector<16x32xf32>
    %24 = arith.addf %22, %23 : vector<16x32xf32>
    %c0_9 = arith.constant 0 : index
    %c0_10 = arith.constant 0 : index
    %25 = vector.load %arg4[%c0_9, %c0_10] : memref<16x32xf32, #tpu.memory_space<vmem>>, vector<16x32xf32>
    tpu.vector_store %arg4[%c0_9, %c0_10], %24 {strides = array<i32>} : memref<16x32xf32, #tpu.memory_space<vmem>>, vector<16x32xf32>,
    return
  }
  func.func @transform_0(%arg0: i32) -> (i32, i32) {
    %c0_i32 = arith.constant 0 : i32
    %c0_i32_0 = arith.constant 0 : i32
    return %arg0, %c0_i32 : i32, i32
  }
  func.func @transform_1(%arg0: i32) -> (i32, i32) {
    %c0_i32 = arith.constant 0 : i32
    %c0_i32_0 = arith.constant 0 : i32
    %c0_i32_1 = arith.constant 0 : i32
    return %c0_i32, %c0_i32_0 : i32, i32
  }
  func.func @transform_2(%arg0: i32) -> (i32, i32) {
    %c0_i32 = arith.constant 0 : i32
    %c0_i32_0 = arith.constant 0 : i32
    %c0_i32_1 = arith.constant 0 : i32
    return %c0_i32, %c0_i32_0 : i32, i32
  }
  func.func @transform_3(%arg0: i32) -> (i32, i32) {
    %c0_i32 = arith.constant 0 : i32
    %c0_i32_0 = arith.constant 0 : i32
    return %arg0, %c0_i32 : i32, i32
  }
}

</mosaic_0001>

<bundles_post_ra>
// kernel: transformer_encoder.9
= control target key start
LH: loop header
LB: loop body
LE: loop exit
PB: predicated region body
PF: predicated region fallthrough
CT: control target
= control target key end

     0   :  { %vm19_vm0 = vcmask 261120   ;;  %s186_s0 = inlined_call_operand.vmem [shape: f32[16,32], index: 0, kind: input, shape index: {}]   ;;  %s187_s1 = inlined_call_operand.vmem [shape: f32[1,32], index: 1, kind: input, shape index: {}]   ;;  %s188_s2 = inlined_call_operand.vmem [shape: f32[1,32], index: 2, kind: input, shape index: {}]   ;;  %s189_s3 = inlined_call_operand.hbm [shape: f32[16,32], index: 3, kind: output, shape index: {}]  }
   0x1   :  { %v15_v0 = vld [vmem:[%s186_s0] sm:$0xff]  ;;  %v16_v1 = vld [vmem:[%s186_s0 + $0x8] sm:$0xff] }
   0x2   :  { %v20_v2 = vsel %vm19_vm0, %v15_v0, 0.0 }
   0x3   :  { %8 = vsyncpa [#allocation3], 0  ;;  %21 = vadd.xlane.f32.xlu0 %v20_v2  ;;  %v23_v3 = vsel %vm19_vm0, %v16_v1, 0.0  ;;  %v96_v30 = vld [vmem:[%s187_s1] ss:$0 sm:$0xff]  ;;  %s133_s19 = smov [#allocation2]  }
   0x4   :  { %v97_v33 = vld [vmem:[%s188_s2] ss:$0 sm:$0xff]  ;;  %s85_s20 = sshll.u32 %s133_s19, 4  ;;  %s86_s20 = int_to_ptr.vmem [resolvable:$true] %s85_s20 }
   0x5   :  { %s109_s1 = scalar_lea.vmem %s86_s20, 256  ;;  %p114_p1 = scmp.lt.s32.totalorder %s86_s20, %s86_s20 }
   0x6   :  { %p110_p0 = scmp.ne.s32.totalorder %s86_s20, %s109_s1  ;;  %p115_p2 = scmp.lt.s32.totalorder %s109_s1, %s109_s1 }
   0x7   :  { %24 = vadd.xlane.f32.xlu0 %v23_v3 }
   0x8   :  { %p116_p3 = por %p115_p2, %p114_p1 }
   0xa   :  { %p117_p4 = pnand %p116_p3, %p110_p0 }
  0x90   :  { %v22_v4 = vpop.xlane.xlu0 %21 }
  0x91   :  { %v27_v5 = vmul.f32 0.03125, %v22_v4 }
  0x93   :  { %v29_v6 = vsub.f32 %v15_v0, %v27_v5 }
  0x94   :  { %v25_v7 = vpop.xlane.xlu0 %24 }
  0x95   :  { %v28_v8 = vmul.f32 0.03125, %v25_v7  ;;  %v31_v9 = vmul.f32 %v29_v6, %v29_v6  ;;  %v62_v31 = vmul.f32 %v96_v30, %v29_v6 }
  0x97   :  { %v30_v10 = vsub.f32 %v16_v1, %v28_v8  ;;  %v33_v11 = vsel %vm19_vm0, %v31_v9, 0.0 }
  0x98   :  { %34 = vadd.xlane.f32.xlu1 %v33_v11 }
  0x99   :  { %v32_v12 = vmul.f32 %v30_v10, %v30_v10  ;;  %v63_v35 = vmul.f32 %v96_v30, %v30_v10 }
  0x9b   :  { %v36_v13 = vsel %vm19_vm0, %v32_v12, 0.0 }
  0x9c   :  { %37 = vadd.xlane.f32.xlu1 %v36_v13 }
 0x125   :  { %v35_v14 = vpop.xlane.xlu1 %34 }
 0x126   :  { %v40_v15 = vmul.f32 0.032258064, %v35_v14 }
 0x128   :  { %101 = vrsqrt.f32 %v40_v15  ;;  %vm44_vm1 = vcmp.eq.f32.partialorder %v40_v15, inf  ;;  %v47_v20 = vand.u32 2147483648, %v40_v15  ;;  %vm46_vm2 = vcmp.eq.f32.partialorder %v40_v15, 0.0 }
 0x129   :  { %v38_v16 = vpop.xlane.xlu1 %37 }
 0x12a   :  { %v41_v17 = vmul.f32 0.032258064, %v38_v16 }
 0x12c   :  { %103 = vrsqrt.f32 %v41_v17  ;;  %vm51_vm3 = vcmp.eq.f32.partialorder %v41_v17, inf  ;;  %v54_v26 = vand.u32 2147483648, %v41_v17  ;;  %vm53_vm4 = vcmp.eq.f32.partialorder %v41_v17, 0.0 }
 0x132   :  { %v102_v18 = vpop.eup %101 }
 0x133   :  { %v43_v19 = vmul.f32 %v102_v18, %v40_v15 }
 0x135   :  { %v45_v21 = vsel %vm44_vm1, %v40_v15, %v43_v19 }
 0x136   :  { %v104_v22 = vpop.eup %103  ;;  %v48_v23 = vsel %vm46_vm2, %v47_v20, %v45_v21 }
 0x137   :  { %v64_v24 = vadd.f32 1e-06, %v48_v23  ;;  %v50_v25 = vmul.f32 %v104_v22, %v41_v17 }
 0x139   :  { %105 = vrcp.f32 %v64_v24  ;;  %v52_v27 = vsel %vm51_vm3, %v41_v17, %v50_v25 }
 0x13a   :  { %v55_v28 = vsel %vm53_vm4, %v54_v26, %v52_v27 }
 0x13b   :  { %v65_v29 = vadd.f32 1e-06, %v55_v28 }
 0x13d   :  { %107 = vrcp.f32 %v65_v29 }
 0x143   :  { %v106_v32 = vpop.eup %105 }
 0x144   :  { %v67_v34 = vmul.f32 %v106_v32, %v62_v31 }
 0x146   :  { %v76_v36 = vadd.f32 %v97_v33, %v67_v34 }
 0x147   :  { %v108_v37 = vpop.eup %107 }
 0x148   :  { %v69_v38 = vmul.f32 %v108_v37, %v63_v35  ;;  %78 = vst.msk [vmem:[#allocation2] sm:$0xff] %vm19_vm0, %v76_v36 }
 0x14a   :  { %v77_v39 = vadd.f32 %v97_v33, %v69_v38 }
 0x14c   :  { %79 = vst.msk [vmem:[#allocation2 + $0x8] sm:$0xff] %vm19_vm0, %v77_v39 }
 0x14d   :  { %120 = shalt.err (!%p117_p4)
}
 0x14e   :  { %s121_s22 = scalar_lea.hbm %s189_s3, 256 }
 0x14f   :  { %p122_p5 = scmp.ne.s32.totalorder %s189_s3, %s121_s22  ;;  %p125_p6 = scmp.lt.u32.totalorder %s121_s22, %s189_s3 }
 0x151   :  { %p127_p7 = pnand %p125_p6, %p122_p5 }
 0x153   :  { %130 = shalt.err (!%p127_p7)
}
 0x154   :  { %s134_s27 = smov 128   ;;  %s135_s28 = smov 8  }
 0x155   :  { %91 = dma.vmem_to_hbm [thread:$0]  %s86_s20, 256, %s189_s3, [#allocation3], %s134_s27, %s134_s27, %s135_s28  }
 0x156   :  { %131 = dma.done.wait [#allocation3], 256  }
 0x157   :  { %132 = vsyncadd [#allocation3], 4294967040 }
 0x158   :  { %95 = vsyncpa [#allocation3], 1 }

// kernel: transformer_encoder.6
= control target key start
LH: loop header
LB: loop body
LE: loop exit
PB: predicated region body
PF: predicated region fallthrough
CT: control target
= control target key end

     0   :  { %vm31_vm0 = vcmask 261120   ;;  %v309_v14 = vmov 0.0   ;;  %vm310_vm1 = vmmov 0   ;;  %vm200_vm6 = vcmask 523264   ;;  %s410_s0 = inlined_call_operand.vmem [shape: f32[16,32], index: 0, kind: input, shape index: {}]   ;;  %s411_s3 = inlined_call_operand.vmem [shape: bf16[32,64], index: 3, kind: input, shape index: {}]   ;;  %s412_s5 = inlined_call_operand.vmem [shape: bf16[64,32], index: 5, kind: input, shape index: {}]   ;;  %s413_s1 = inlined_call_operand.vmem [shape: f32[1,32], index: 1, kind: input, shape index: {}]   ;;  %s414_s2 = inlined_call_operand.vmem [shape: f32[1,32], index: 2, kind: input, shape index: {}]   ;;  %s415_s4 = inlined_call_operand.vmem [shape: f32[1,64], index: 4, kind: input, shape index: {}]   ;;  %s416_s6 = inlined_call_operand.vmem [shape: f32[1,32], index: 6, kind: input, shape index: {}]   ;;  %s417_s7 = inlined_call_operand.vmem [shape: f32[16,32], index: 7, kind: output, shape index: {}]  }
   0x1   :  { %v354_v0 = vld [vmem:[%s410_s0] sm:$0xff]  ;;  %v359_v1 = vld [vmem:[%s410_s0 + $0x8] sm:$0xff]  ;;  %273 = vmatprep.subr.bf16.mxu0 %v309_v14  ;;  %277 = vmatprep.mubr.msk.bf16.mxu0 %vm310_vm1, %v309_v14  ;;  %v299_v46 = vld [vmem:[%s412_s5 + $0x10] sm:$0xff]  }
   0x2   :  { %v32_v2 = vsel %vm31_vm0, %v354_v0, 0.0  ;;  %v35_v3 = vsel %vm31_vm0, %v359_v1, 0.0  ;;  %v295_v15 = vld [vmem:[%s411_s3] sm:$0xff]   ;;  %281 = vmatprep.subr.bf16.mxu1 %v309_v14  ;;  %289 = vmatprep.mubr.msk.bf16.mxu1 %vm310_vm1, %v309_v14  ;;  %v296_v16 = vld [vmem:[%s411_s3 + $0x8] sm:$0xff]   ;;  %v300_v47 = vld [vmem:[%s412_s5 + $0x18] sm:$0xff]  }
   0x3   :  { %33 = vadd.xlane.f32.xlu0 %v32_v2  ;;  %274 = vmatpush3.bf16.msra.mxu0 %v295_v15  ;;  %v297_v17 = vld [vmem:[%s412_s5] sm:$0xff]   ;;  %v298_v18 = vld [vmem:[%s412_s5 + $0x8] sm:$0xff]  }
   0x4   :  { %275 = vmatprep.subr.bf16.mxu0 %v309_v14  ;;  %282 = vmatpush3.bf16.msra.mxu1 %v297_v17  ;;  %v253_v35 = vld [vmem:[%s413_s1] ss:$0 sm:$0xff] }
   0x5   :  { %283 = vmatprep.subr.bf16.mxu1 %v309_v14  ;;  %v254_v41 = vld [vmem:[%s414_s2] ss:$0 sm:$0xff] }
   0x6   :  { %v255_v48 = vld [vmem:[%s415_s4] ss:$0 sm:$0xff] }
   0x7   :  { %36 = vadd.xlane.f32.xlu0 %v35_v3  ;;  %276 = vmatpush3.bf16.msra.mxu0 %v296_v16  ;;  %v259_v58 = vld [vmem:[%s416_s6] ss:$0 sm:$0xff] }
   0x8   :  { %284 = vmatpush3.bf16.msra.mxu1 %v298_v18 }
   0x9   :  { %285 = vmatprep.subr.bf16.mxu1 %v309_v14 }
   0xc   :  { %286 = vmatpush3.bf16.msra.mxu1 %v299_v46 }
   0xd   :  { %287 = vmatprep.subr.bf16.mxu1 %v309_v14 }
  0x10   :  { %288 = vmatpush3.bf16.msra.mxu1 %v300_v47 }
  0x90   :  { %v34_v4 = vpop.xlane.xlu0 %33 }
  0x91   :  { %v39_v5 = vmul.f32 0.03125, %v34_v4 }
  0x93   :  { %v41_v6 = vsub.f32 %v354_v0, %v39_v5 }
  0x94   :  { %v37_v7 = vpop.xlane.xlu0 %36 }
  0x95   :  { %v40_v8 = vmul.f32 0.03125, %v37_v7  ;;  %v43_v9 = vmul.f32 %v41_v6, %v41_v6  ;;  %v74_v37 = vmul.f32 %v253_v35, %v41_v6 }
  0x97   :  { %v42_v10 = vsub.f32 %v359_v1, %v40_v8  ;;  %v45_v11 = vsel %vm31_vm0, %v43_v9, 0.0 }
  0x98   :  { %46 = vadd.xlane.f32.xlu1 %v45_v11 }
  0x99   :  { %v44_v12 = vmul.f32 %v42_v10, %v42_v10  ;;  %v75_v38 = vmul.f32 %v253_v35, %v42_v10 }
  0x9b   :  { %v48_v13 = vsel %vm31_vm0, %v44_v12, 0.0 }
  0x9c   :  { %49 = vadd.xlane.f32.xlu1 %v48_v13 }
 0x125   :  { %v47_v19 = vpop.xlane.xlu1 %46 }
 0x126   :  { %v52_v20 = vmul.f32 0.032258064, %v47_v19 }
 0x128   :  { %301 = vrsqrt.f32 %v52_v20  ;;  %vm56_vm2 = vcmp.eq.f32.partialorder %v52_v20, inf  ;;  %v59_v25 = vand.u32 2147483648, %v52_v20  ;;  %vm58_vm3 = vcmp.eq.f32.partialorder %v52_v20, 0.0 }
 0x129   :  { %v50_v21 = vpop.xlane.xlu1 %49 }
 0x12a   :  { %v53_v22 = vmul.f32 0.032258064, %v50_v21 }
 0x12c   :  { %303 = vrsqrt.f32 %v53_v22  ;;  %vm63_vm4 = vcmp.eq.f32.partialorder %v53_v22, inf  ;;  %v66_v31 = vand.u32 2147483648, %v53_v22  ;;  %vm65_vm5 = vcmp.eq.f32.partialorder %v53_v22, 0.0 }
 0x132   :  { %v302_v23 = vpop.eup %301 }
 0x133   :  { %v55_v24 = vmul.f32 %v302_v23, %v52_v20 }
 0x135   :  { %v57_v26 = vsel %vm56_vm2, %v52_v20, %v55_v24 }
 0x136   :  { %v304_v27 = vpop.eup %303  ;;  %v60_v28 = vsel %vm58_vm3, %v59_v25, %v57_v26 }
 0x137   :  { %v76_v29 = vadd.f32 1e-06, %v60_v28  ;;  %v62_v30 = vmul.f32 %v304_v27, %v53_v22 }
 0x139   :  { %305 = vrcp.f32 %v76_v29  ;;  %v64_v32 = vsel %vm63_vm4, %v53_v22, %v62_v30 }
 0x13a   :  { %v67_v33 = vsel %vm65_vm5, %v66_v31, %v64_v32 }
 0x13b   :  { %v77_v34 = vadd.f32 1e-06, %v67_v33 }
 0x13d   :  { %307 = vrcp.f32 %v77_v34 }
 0x143   :  { %v306_v36 = vpop.eup %305 }
 0x144   :  { %v79_v39 = vmul.f32 %v306_v36, %v74_v37 }
 0x146   :  { %v88_v43 = vadd.f32 %v254_v41, %v79_v39 }
 0x147   :  { %v308_v40 = vpop.eup %307 }
 0x148   :  { %v81_v42 = vmul.f32 %v308_v40, %v75_v38 }
 0x14a   :  { %v89_v44 = vadd.f32 %v254_v41, %v81_v42 }
 0x14c   :  { %v90_v45 = vpack.c.bf16 %v89_v44, %v88_v43 }
 0x14e   :  { %278 = vmatmul.mubr.msk.bf16.vlgmr.msra.gmra.mrb[0].mxu0 %vm31_vm0, %v90_v45 }
 0x221   :  { %v151_v49 = vpop.f32.mrb[0].mxu0 }
 0x222   :  { %v152_v50 = vadd.f32 %v255_v48, %v151_v49  ;;  %v279_v51 = vpop.f32.mrb[1].mxu0 }
 0x223   :  { %v154_v52 = vpop.f32.mrb[2].mxu0 }
 0x224   :  { %v155_v53 = vadd.f32 %v255_v48, %v154_v52  ;;  %v280_v54 = vpop.f32.mrb[3].mxu0  ;;  %v158_v55 = vmax.f32 %v152_v50, 0.0 }
 0x226   :  { %v159_v56 = vmax.f32 %v155_v53, 0.0 }
 0x228   :  { %v160_v57 = vpack.c.bf16 %v159_v56, %v158_v55 }
 0x22a   :  { %290 = vmatmul.mubr.msk.bf16.vlgmr.msra.gmra.mrb[0].mxu1 %vm200_vm6, %v160_v57 }
 0x2fd   :  { %v238_v59 = vpop.f32.mrb[0].mxu1 }
 0x2fe   :  { %v239_v60 = vadd.f32 %v259_v58, %v238_v59  ;;  %v291_v61 = vpop.f32.mrb[1].mxu1 }
 0x2ff   :  { %v241_v62 = vpop.f32.mrb[2].mxu1 }
 0x300   :  { %v245_v63 = vadd.f32 %v239_v60, %v354_v0  ;;  %v242_v2 = vadd.f32 %v259_v58, %v241_v62  ;;  %v292_v3 = vpop.f32.mrb[3].mxu1 }
 0x302   :  { %247 = vst.msk [vmem:[%s417_s7] sm:$0xff] %vm31_vm0, %v245_v63  ;;  %v246_v4 = vadd.f32 %v242_v2, %v359_v1 }
 0x304   :  { %248 = vst.msk [vmem:[%s417_s7 + $0x8] sm:$0xff] %vm31_vm0, %v246_v4 }

// kernel: transformer_encoder.5
= control target key start
LH: loop header
LB: loop body
LE: loop exit
PB: predicated region body
PF: predicated region fallthrough
CT: control target
= control target key end

     0   :  { %s1259_s27 = smov 0   ;;  %s1392_s0 = inlined_call_operand.vmem [shape: f32[2,8,32], index: 0, kind: input, shape index: {}]   ;;  %s1393_s1 = inlined_call_operand.vmem [shape: f32[1,32], index: 1, kind: input, shape index: {}]   ;;  %s1394_s2 = inlined_call_operand.vmem [shape: f32[1,32], index: 2, kind: input, shape index: {}]   ;;  %s1395_s3 = inlined_call_operand.vmem [shape: bf16[32,96], index: 3, kind: input, shape index: {}]   ;;  %s1396_s4 = inlined_call_operand.vmem [shape: f32[1,96], index: 4, kind: input, shape index: {}]   ;;  %s1397_s5 = inlined_call_operand.vmem [shape: bf16[32,32], index: 5, kind: input, shape index: {}]   ;;  %s1398_s6 = inlined_call_operand.vmem [shape: f32[1,32], index: 6, kind: input, shape index: {}]   ;;  %s1399_s7 = inlined_call_operand.vmem [shape: f32[2,1,8], index: 7, kind: input, shape index: {}]   ;;  %s1400_s8 = inlined_call_operand.vmem [shape: f32[2,8,32], index: 8, kind: output, shape index: {}]  }
   0x1 LB: > { %s1028_s28 = sadd.s32 4294967295, %s1196_s27   ;;  %p1032_p0 = scmp.ge.s32.totalorder %s1196_s27, 1  ;;  %s1196_s27 = sphi %s1259_s27, %s18_s27  }
   0x2   : > { %p269_p1 = scmp.lt.s32.totalorder %s1196_s27, 3 }
   0x4   : > { %p270_p2 = pnand %p1032_p0, %p269_p1 }
   0x5   : > { %p304_p3 = scmp.lt.s32.totalorder (!%p270_p2), %s1028_s28, 1  ;;  %vm319_vm0 = vcmask (!%p270_p2), 261120   ;;  %v1166_v7 = vld [vmem:[%s1395_s3] sm:$0xff] (!%p270_p2)   ;;  %v1198_v8 = vmov (!%p270_p2), 0.0   ;;  %vm1199_vm1 = vmmov (!%p270_p2), 0   ;;  %v1167_v9 = vld [vmem:[%s1395_s3 + $0x8] sm:$0xff] (!%p270_p2)  }
   0x6   : > { %273 = sbr.rel (%p270_p2) target bundleno = 1824 (0x720), region = 52  ;;  %1078 = vmatprep.subr.bf16.mxu0 (!%p270_p2), %v1198_v8  ;;  %1082 = vmatprep.mubr.msk.bf16.mxu0 (!%p270_p2), %vm1199_vm1, %v1198_v8  ;;  %v1035_v18 = vld [vmem:[%s1393_s1] ss:$0 sm:$0xff] (!%p270_p2)  ;;  %s1200_s21 = smov (!%p270_p2), 120   ;;  %vm428_vm4 = vcmask (!%p270_p2), 64512   ;;  %vm500_vm5 = vcmask (!%p270_p2), 1043456  }
   0x7   : > { %1079 = vmatpush3.bf16.msra.mxu0 (!%p270_p2), %v1166_v7  ;;  %1086 = vmatprep.subr.bf16.mxu1 (!%p270_p2), %v1198_v8  ;;  %v1036_v21 = vld [vmem:[%s1394_s2] ss:$0 sm:$0xff] (!%p270_p2)  ;;  %s1201_s22 = smov (!%p270_p2), 96   ;;  %s1202_s23 = smov (!%p270_p2), 88   ;;  %vm893_vm6 = vcmask (!%p270_p2), 130048   ;;  %vm895_vm7 = vcmask (!%p270_p2), 195584  }
   0x8   : > { %1080 = vmatprep.subr.bf16.mxu0 (!%p270_p2), %v1198_v8  ;;  %1088 = vmatprep.mubr.msk.bf16.mxu1 (!%p270_p2), %vm1199_vm1, %v1198_v8  ;;  %v1037_v25 = vld [vmem:[%s1396_s4] ss:$0 sm:$0xff] (!%p270_p2)  ;;  %s1203_s24 = smov (!%p270_p2), 80   ;;  %s1204_s25 = smov (!%p270_p2), 112  }
   0x9   : > { %s1205_s26 = smov (!%p270_p2), 72   ;;  %s1206_s30 = smov (!%p270_p2), 104  }
   0xa   : > { %s1207_s12 = smov (!%p270_p2), 64   ;;  %s1208_s13 = smov (!%p270_p2), 56  }
   0xb   : > { %1081 = vmatpush3.bf16.msra.mxu0 (!%p270_p2), %v1167_v9  ;;  %s1209_s14 = smov (!%p270_p2), 48   ;;  %s1210_s15 = smov (!%p270_p2), 40  }
   0xc   : > { %1092 = vmatprep.subr.bf16.mxu0 (!%p270_p2), %v1198_v8  ;;  %s1211_s16 = smov (!%p270_p2), 8  }
   0xd   : > { %s1402_s28 = smov (!%p304_p3, %s1028_s28), 1 }
   0xe   : > { %s1033_s29 = sshll.u32 %s1402_s28, 3  ;;  %s310_s11 = scalar_lea.vmem %s1399_s7, %s1402_s28 }
   0xf   : > { %s307_s10 = scalar_lea.vmem %s1392_s0, %s1033_s29  ;;  %v1042_v44 = vld [vmem:[%s310_s11] ss:$0 sm:$0xff] }
  0x10   : > { %v1275_v0 = vld [vmem:[%s307_s10] sm:$0xff] }
  0x11   : > { %v320_v1 = vsel %vm319_vm0, %v1275_v0, 0.0 }
  0x12   : > { %321 = vadd.xlane.f32.xlu0 %v320_v1 }
  0x9f   : > { %v322_v2 = vpop.xlane.xlu0 %321 }
  0xa0   : > { %v324_v3 = vmul.f32 0.03125, %v322_v2 }
  0xa2   : > { %v325_v4 = vsub.f32 %v1275_v0, %v324_v3 }
  0xa4   : > { %v326_v5 = vmul.f32 %v325_v4, %v325_v4  ;;  %v345_v19 = vmul.f32 %v1035_v18, %v325_v4 }
  0xa6   : > { %v327_v6 = vsel %vm319_vm0, %v326_v5, 0.0 }
  0xa7   : > { %328 = vadd.xlane.f32.xlu0 %v327_v6 }
 0x134   : > { %v329_v10 = vpop.xlane.xlu0 %328 }
 0x135   : > { %v331_v11 = vmul.f32 0.032258064, %v329_v10 }
 0x137   : > { %1170 = vrsqrt.f32 %v331_v11  ;;  %vm334_vm2 = vcmp.eq.f32.partialorder %v331_v11, inf  ;;  %v337_v14 = vand.u32 2147483648, %v331_v11  ;;  %vm336_vm3 = vcmp.eq.f32.partialorder %v331_v11, 0.0 }
 0x141   : > { %v1171_v12 = vpop.eup %1170 }
 0x142   : > { %v333_v13 = vmul.f32 %v1171_v12, %v331_v11 }
 0x144   : > { %v335_v15 = vsel %vm334_vm2, %v331_v11, %v333_v13 }
 0x145   : > { %v338_v16 = vsel %vm336_vm3, %v337_v14, %v335_v15 }
 0x146   : > { %v346_v17 = vadd.f32 1e-06, %v338_v16 }
 0x148   : > { %1172 = vrcp.f32 %v346_v17 }
 0x152   : > { %v1173_v20 = vpop.eup %1172 }
 0x153   : > { %v348_v22 = vmul.f32 %v1173_v20, %v345_v19 }
 0x155   : > { %v355_v23 = vadd.f32 %v1036_v21, %v348_v22 }
 0x157   : > { %v356_v24 = vpack.c.bf16 %v355_v23, %v355_v23 }
 0x159   : > { %1083 = vmatmul.mubr.msk.bf16.vlgmr.msra.gmra.mrb[0].mxu0 %vm319_vm0, %v356_v24 }
 0x15a   : > { %1094 = vmatprep.mubr.msk.bf16.mxu0 %vm1199_vm1, %v1198_v8 }
 0x22c   : > { %v417_v26 = vpop.f32.mrb[0].mxu0 }
 0x22d   : > { %v418_v27 = vadd.f32 %v1037_v25, %v417_v26  ;;  %v1084_v28 = vpop.f32.mrb[1].mxu0 }
 0x22e   : > { %v420_v29 = vpop.f32.mrb[2].mxu0 }
 0x22f   : > { %v1307_v30 = vpack.c.bf16 %v418_v27, %v418_v27  ;;  %v1085_v31 = vpop.f32.mrb[3].mxu0 }
 0x231   : > { %544 = vrot.lane.b32.xlu0 %v1307_v30, %s1200_s21  ;;  %426 = vrot.lane.b32.xlu1 %v1307_v30, %s1201_s22  ;;  %s1212_s21 = smov 16   ;;  %s1213_s22 = smov 24  }
 0x235   : > { %546 = vrot.lane.b32.xlu1 %v1307_v30, %s1202_s23 }
 0x239   : > { %658 = vrot.lane.b32.xlu1 %v1307_v30, %s1203_s24 }
 0x23d   : > { %656 = vrot.lane.b32.xlu1 %v1307_v30, %s1204_s25 }
 0x241   : > { %770 = vrot.lane.b32.xlu1 %v1307_v30, %s1205_s26 }
 0x245   : > { %768 = vrot.lane.b32.xlu1 %v1307_v30, %s1206_s30  ;;  %s314_s30 = scalar_lea.vmem %s1400_s8, %s1033_s29 }
 0x2a3   : > { %v427_v32 = vpop.permute.xlu1 %426  ;;  %v545_v37 = vpop.permute.xlu0 %544 }
 0x2a4   : > { %v433_v33 = vsel %vm428_vm4, %v427_v32, 0 }
 0x2a5   : > { %1087 = vmatpush3.bf16.xpose.msra.mxu1 %v433_v33 }
 0x2a6   : > { %1098 = vmatprep.subr.bf16.mxu1 %v1198_v8 }
 0x2a7   : > { %v547_v34 = vpop.permute.xlu1 %546 }
 0x2a8   : > { %v552_v35 = vsel %vm428_vm4, %v547_v34, 0 }
 0x2ab   : > { %v659_v36 = vpop.permute.xlu1 %658 }
 0x2ac   : > { %1089 = vmatmul.mubr.msk.bf16.vlgmr.msra.gmra.mrb[0].mxu1 %vm428_vm4, %v1307_v30  ;;  %v664_v39 = vsel %vm428_vm4, %v659_v36, 0 }
 0x2ad   : > { %1099 = vmatpush3.bf16.xpose.msra.mxu1 %v552_v35  ;;  %1100 = vmatprep.mubr.msk.bf16.mxu1 %vm1199_vm1, %v1198_v8 }
 0x2ae   : > { %1110 = vmatprep.subr.bf16.mxu1 %v1198_v8 }
 0x2af   : > { %v657_v38 = vpop.permute.xlu1 %656 }
 0x2b3   : > { %v771_v40 = vpop.permute.xlu1 %770 }
 0x2b4   : > { %1101 = vmatmul.mubr.msk.bf16.vlgmr.msra.gmra.mrb[4].mxu1 %vm428_vm4, %v545_v37  ;;  %v776_v41 = vsel %vm428_vm4, %v771_v40, 0 }
 0x2b5   : > { %1111 = vmatpush3.bf16.xpose.msra.mxu1 %v664_v39  ;;  %1112 = vmatprep.mubr.msk.bf16.mxu1 %vm1199_vm1, %v1198_v8 }
 0x2b6   : > { %1122 = vmatprep.subr.bf16.mxu1 %v1198_v8 }
 0x2b7   : > { %v769_v42 = vpop.permute.xlu1 %768 }
 0x2bc   : > { %1113 = vmatmul.mubr.msk.bf16.vlgmr.msra.gmra.mrb[8].mxu1 %vm428_vm4, %v657_v38 }
 0x2bd   : > { %1123 = vmatpush3.bf16.xpose.msra.mxu1 %v776_v41  ;;  %1124 = vmatprep.mubr.msk.bf16.mxu1 %vm1199_vm1, %v1198_v8 }
 0x2be   : > { %1134 = vmatprep.subr.bf16.mxu1 %v1198_v8 }
 0x2c4   : > { %1125 = vmatmul.mubr.msk.bf16.vlgmr.msra.gmra.mrb[12].mxu1 %vm428_vm4, %v769_v42 }
 0x2c5   : > { %1138 = vmatprep.mubr.msk.bf16.mxu1 %vm1199_vm1, %v1198_v8 }
 0x37f   : > { %v469_v43 = vpop.f32.mrb[0].mxu1 }
 0x380   : > { %v475_v45 = vmul.f32 0.35355338, %v469_v43  ;;  %v1090_v46 = vpop.f32.mrb[1].mxu1 }
 0x381   : > { %v472_v47 = vpop.f32.mrb[2].mxu1 }
 0x382   : > { %v1091_v48 = vpop.f32.mrb[3].mxu1  ;;  %v482_v49 = vadd.f32 %v1042_v44, %v475_v45 }
 0x384   : > { %v483_v50 = vsel %vm428_vm4, %v482_v49, -inf }
 0x385   : > { %484 = vmax.xlane.f32.xlu1 %v483_v50 }
 0x387   : > { %v588_v51 = vpop.f32.mrb[4].mxu1 }
 0x388   : > { %v594_v52 = vmul.f32 0.35355338, %v588_v51  ;;  %v1102_v53 = vpop.f32.mrb[5].mxu1 }
 0x389   : > { %v591_v54 = vpop.f32.mrb[6].mxu1 }
 0x38a   : > { %v1103_v55 = vpop.f32.mrb[7].mxu1  ;;  %v595_v56 = vadd.f32 %v1042_v44, %v594_v52 }
 0x38c   : > { %v596_v57 = vsel %vm428_vm4, %v595_v56, -inf }
 0x38d   : > { %597 = vmax.xlane.f32.xlu0 %v596_v57 }
 0x38f   : > { %v700_v58 = vpop.f32.mrb[8].mxu1 }
 0x390   : > { %v706_v59 = vmul.f32 0.35355338, %v700_v58  ;;  %v1114_v60 = vpop.f32.mrb[9].mxu1 }
 0x391   : > { %v703_v61 = vpop.f32.mrb[10].mxu1 }
 0x392   : > { %v1115_v62 = vpop.f32.mrb[11].mxu1  ;;  %v707_v63 = vadd.f32 %v1042_v44, %v706_v59 }
 0x393   : > { %v1168_v62 = vld [vmem:[%s1397_s5] sm:$0xff]  }
 0x394   : > { %v708_v1 = vsel %vm428_vm4, %v707_v63, -inf  ;;  %1135 = vmatpush3.bf16.msra.mxu1 %v1168_v62 }
 0x395   : > { %709 = vmax.xlane.f32.xlu1 %v708_v1  ;;  %1136 = vmatprep.subr.bf16.mxu1 %v1198_v8 }
 0x397   : > { %v812_v2 = vpop.f32.mrb[12].mxu1 }
 0x398   : > { %v818_v3 = vmul.f32 0.35355338, %v812_v2  ;;  %v1126_v4 = vpop.f32.mrb[13].mxu1 }
 0x399   : > { %v815_v5 = vpop.f32.mrb[14].mxu1 }
 0x39a   : > { %v1127_v6 = vpop.f32.mrb[15].mxu1  ;;  %v819_v7 = vadd.f32 %v1042_v44, %v818_v3 }
 0x39c   : > { %v820_v9 = vsel %vm428_vm4, %v819_v7, -inf }
 0x39d   : > { %821 = vmax.xlane.f32.xlu0 %v820_v9 }
 0x412   : > { %v485_v10 = vpop.xlane.xlu1 %484 }
 0x413   : > { %v486_v11 = vsub.f32 %v482_v49, %v485_v10 }
 0x415   : > { %v487_v12 = vmul.f32 1.442695, %v486_v11 }
 0x417   : > { %1174 = vpow2.f32 %v487_v12 }
 0x41a   : > { %v598_v13 = vpop.xlane.xlu0 %597 }
 0x41b   : > { %v599_v14 = vsub.f32 %v595_v56, %v598_v13 }
 0x41d   : > { %v600_v15 = vmul.f32 1.442695, %v599_v14 }
 0x41f   : > { %1176 = vpow2.f32 %v600_v15 }
 0x421   : > { %v1175_v16 = vpop.eup %1174 }
 0x422   : > { %v489_v17 = vsel %vm428_vm4, %v1175_v16, 0.0  ;;  %v710_v25 = vpop.xlane.xlu1 %709 }
 0x423   : > { %490 = vadd.xlane.f32.xlu1 %v489_v17  ;;  %v711_v26 = vsub.f32 %v707_v63, %v710_v25  ;;  %v1169_v63 = vld [vmem:[%s1397_s5 + $0x8] sm:$0xff]  }
 0x424   : > { %1137 = vmatpush3.bf16.msra.mxu1 %v1169_v63 }
 0x425   : > { %v712_v27 = vmul.f32 1.442695, %v711_v26 }
 0x429   : > { %v1177_v18 = vpop.eup %1176 }
 0x42a   : > { %v822_v19 = vpop.xlane.xlu0 %821  ;;  %v602_v20 = vsel %vm428_vm4, %v1177_v18, 0.0 }
 0x42b   : > { %v823_v21 = vsub.f32 %v819_v7, %v822_v19  ;;  %603 = vadd.xlane.f32.xlu0 %v602_v20 }
 0x42d   : > { %v824_v22 = vmul.f32 1.442695, %v823_v21 }
 0x42f   : > { %1178 = vpow2.f32 %v824_v22 }
 0x430   : > { %1180 = vpow2.f32 %v712_v27 }
 0x434   : > { %495 = vrot.lane.b32.xlu1 %v1307_v30, %s1207_s12 }
 0x439   : > { %v1179_v23 = vpop.eup %1178 }
 0x43a   : > { %v826_v24 = vsel %vm428_vm4, %v1179_v23, 0.0  ;;  %v1181_v28 = vpop.eup %1180 }
 0x43b   : > { %827 = vadd.xlane.f32.xlu0 %v826_v24  ;;  %v714_v29 = vsel %vm428_vm4, %v1181_v28, 0.0 }
 0x451   : > { %608 = vrot.lane.b32.xlu0 %v1307_v30, %s1208_s13 }
 0x458   : > { %715 = vadd.xlane.f32.xlu1 %v714_v29 }
 0x469   : > { %720 = vrot.lane.b32.xlu1 %v1307_v30, %s1209_s14 }
 0x46d   : > { %832 = vrot.lane.b32.xlu1 %v1307_v30, %s1210_s15 }
 0x4b0   : > { %v491_v31 = vpop.xlane.xlu1 %490 }
 0x4b1   : > { %1182 = vrcp.f32 %v491_v31 }
 0x4b4   : > { %v496_v32 = vpop.permute.xlu1 %495 }
 0x4b5   : > { %v502_v33 = vsel %vm500_vm5, %v496_v32, 0 }
 0x4b6   : > { %1093 = vmatpush3.bf16.msra.mxu0 %v502_v33 }
 0x4b7   : > { %1104 = vmatprep.subr.bf16.mxu0 %v1198_v8 }
 0x4b8   : > { %v604_v35 = vpop.xlane.xlu0 %603 }
 0x4b9   : > { %1184 = vrcp.f32 %v604_v35 }
 0x4bb   : > { %v1183_v34 = vpop.eup %1182 }
 0x4bc   : > { %v493_v36 = vmul.f32 %v1183_v34, %v1175_v16  ;;  %v1050_v16 = vld [vmem:[%s1398_s6] ss:$0 sm:$0xff] }
 0x4be   : > { %v494_v37 = vpack.c.bf16 %v493_v36, %v493_v36 }
 0x4c0   : > { %1095 = vmatmul.mubr.msk.bf16.vlgmr.msra.gmra.mrb[4].mxu0 %vm428_vm4, %v494_v37 }
 0x4c1   : > { %1106 = vmatprep.mubr.msk.bf16.mxu0 %vm1199_vm1, %v1198_v8 }
 0x4c3   : > { %v1185_v30 = vpop.eup %1184 }
 0x4c4   : > { %v606_v39 = vmul.f32 %v1185_v30, %v1177_v18 }
 0x4c6   : > { %v607_v42 = vpack.c.bf16 %v606_v39, %v606_v39 }
 0x4c8   : > { %v828_v38 = vpop.xlane.xlu0 %827 }
 0x4cc   : > { %v609_v40 = vpop.permute.xlu0 %608 }
 0x4cd   : > { %v614_v41 = vsel %vm500_vm5, %v609_v40, 0 }
 0x4ce   : > { %1105 = vmatpush3.bf16.msra.mxu0 %v614_v41 }
 0x4cf   : > { %1116 = vmatprep.subr.bf16.mxu0 %v1198_v8 }
 0x4d1   : > { %1107 = vmatmul.mubr.msk.bf16.vlgmr.msra.gmra.mrb[8].mxu0 %vm428_vm4, %v607_v42 }
 0x4d2   : > { %1118 = vmatprep.mubr.msk.bf16.mxu0 %vm1199_vm1, %v1198_v8 }
 0x4e5   : > { %v716_v43 = vpop.xlane.xlu1 %715 }
 0x4e6   : > { %1186 = vrcp.f32 %v716_v43 }
 0x4e7   : > { %1188 = vrcp.f32 %v828_v38 }
 0x4e9   : > { %v721_v44 = vpop.permute.xlu1 %720 }
 0x4ea   : > { %v726_v45 = vsel %vm500_vm5, %v721_v44, 0 }
 0x4eb   : > { %1117 = vmatpush3.bf16.msra.mxu0 %v726_v45 }
 0x4ec   : > { %1128 = vmatprep.subr.bf16.mxu0 %v1198_v8 }
 0x4ed   : > { %v833_v48 = vpop.permute.xlu1 %832 }
 0x4ee   : > { %v838_v51 = vsel %vm500_vm5, %v833_v48, 0 }
 0x4f0   : > { %v1187_v46 = vpop.eup %1186 }
 0x4f1   : > { %v718_v47 = vmul.f32 %v1187_v46, %v1181_v28  ;;  %v1189_v50 = vpop.eup %1188 }
 0x4f2   : > { %v830_v52 = vmul.f32 %v1189_v50, %v1179_v23 }
 0x4f3   : > { %v719_v49 = vpack.c.bf16 %v718_v47, %v718_v47 }
 0x4f4   : > { %v831_v53 = vpack.c.bf16 %v830_v52, %v830_v52 }
 0x4f5   : > { %1119 = vmatmul.mubr.msk.bf16.vlgmr.msra.gmra.mrb[12].mxu0 %vm428_vm4, %v719_v49 }
 0x4f6   : > { %1129 = vmatpush3.bf16.msra.mxu0 %v838_v51  ;;  %1130 = vmatprep.mubr.msk.bf16.mxu0 %vm1199_vm1, %v1198_v8 }
 0x4fd   : > { %1131 = vmatmul.mubr.msk.bf16.vlgmr.msra.gmra.mrb[16].mxu0 %vm428_vm4, %v831_v53 }
 0x593   : > { %v538_v54 = vpop.f32.mrb[4].mxu0 }
 0x594   : > { %v1096_v55 = vpop.f32.mrb[5].mxu0 }
 0x595   : > { %v541_v56 = vpop.f32.mrb[6].mxu0 }
 0x596   : > { %v1097_v57 = vpop.f32.mrb[7].mxu0 }
 0x5a4   : > { %v650_v58 = vpop.f32.mrb[8].mxu0 }
 0x5a5   : > { %881 = vrot.lane.b32.xlu0 %v650_v58, %s1211_s16  ;;  %v1108_v59 = vpop.f32.mrb[9].mxu0 }
 0x5a6   : > { %v653_v60 = vpop.f32.mrb[10].mxu0 }
 0x5a7   : > { %v1109_v61 = vpop.f32.mrb[11].mxu0 }
 0x5c8   : > { %v762_v1 = vpop.f32.mrb[12].mxu0 }
 0x5c9   : > { %885 = vrot.lane.b32.xlu1 %v762_v1, %s1212_s21  ;;  %v1120_v2 = vpop.f32.mrb[13].mxu0 }
 0x5ca   : > { %v765_v3 = vpop.f32.mrb[14].mxu0 }
 0x5cb   : > { %v1121_v4 = vpop.f32.mrb[15].mxu0 }
 0x5d0   : > { %v874_v5 = vpop.f32.mrb[16].mxu0 }
 0x5d1   : > { %889 = vrot.lane.b32.xlu0 %v874_v5, %s1213_s22  ;;  %v1132_v6 = vpop.f32.mrb[17].mxu0 }
 0x5d2   : > { %v877_v7 = vpop.f32.mrb[18].mxu0 }
 0x5d3   : > { %v1133_v9 = vpop.f32.mrb[19].mxu0 }
 0x617   : > { %v882_v10 = vpop.permute.xlu0 %881 }
 0x618   : > { %v892_v8 = vsel %vm428_vm4, %v538_v54, %v882_v10 }
 0x63b   : > { %v886_v11 = vpop.permute.xlu1 %885 }
 0x63c   : > { %v894_v12 = vsel %vm893_vm6, %v892_v8, %v886_v11 }
 0x643   : > { %v890_v13 = vpop.permute.xlu0 %889 }
 0x644   : > { %v896_v14 = vsel %vm895_vm7, %v894_v12, %v890_v13 }
 0x645   : > { %v897_v15 = vpack.c.bf16 %v896_v14, %v896_v14 }
 0x647   : > { %1139 = vmatmul.mubr.msk.bf16.vlgmr.msra.gmra.mrb[16].mxu1 %vm319_vm0, %v897_v15 }
 0x71a   : > { %v958_v17 = vpop.f32.mrb[16].mxu1 }
 0x71b   : > { %v959_v18 = vadd.f32 %v1050_v16, %v958_v17  ;;  %v1140_v19 = vpop.f32.mrb[17].mxu1 }
 0x71c   : > { %v961_v20 = vpop.f32.mrb[18].mxu1 }
 0x71d   : > { %v964_v21 = vadd.f32 %v959_v18, %v1275_v0  ;;  %v1141_v22 = vpop.f32.mrb[19].mxu1 }
 0x71f   : > { %965 = vst.msk [vmem:[%s314_s30] sm:$0xff] %vm319_vm0, %v964_v21 }
 0x720 PF: > { %s18_s27 = sadd.s32 1, %s1196_s27  }
 0x721   : > { %p15_p4 = scmp.ge.s32.totalorder %s18_s27, 4  }
 0x723   :  { %17 = sbr.rel (!%p15_p4) target bundleno = 1 (0x1), region = 85 }

</bundles_post_ra>
